<compile_context>
chip_gen: v7x
topology: tpu7x:2x2x1
jax: 0.10.0
libtpu: 0.0.40
codegen_flags: <defaults>
</compile_context>

<pallas_src>
import jax
import jax.numpy as jnp
from jax.experimental import pallas as pl
from jax.experimental.pallas import tpu as pltpu

_SUBLANE = 8
_LANE = 128


def _tpu_vmem_and_cores():
    """(physical VMEM bytes, TensorCores per chip) with conservative fallbacks."""
    vmem = 64 << 20                                # conservative (v7x per-TC VMEM)
    try:
        info = pltpu.get_tpu_info()
        cap = getattr(info, "vmem_capacity_bytes", None)
        if cap:
            vmem = int(cap)
    except Exception:
        pass
    # v7x: 64 MiB/TC and 2 TCs per chip; v5e/v6e: 128 MiB and 1 TC.
    cores = 2 if vmem <= (80 << 20) else 1
    return vmem, cores


def _pick_divisor(dim, candidates):
    """Largest candidate <= dim that divides dim; else fall back to the full extent."""
    for c in candidates:
        if c <= dim and dim % c == 0:
            return c
    # TODO(synk): dims that are not multiples of 128 fall back to the full
    # extent; very large such dims (odd vocab sizes) should be padded instead.
    return dim


def _choose_tiles(m, K, N, vmem_cap, cores):
    """Pick (tm, tn, tk, resident_x) for y[m, N] = x[m, K] @ w[K, N], bf16."""
    bpe = 2                                        # bf16
    budget = (vmem_cap * 3) // 4                   # headroom for Mosaic internals

    decode = m <= 256
    if decode:
        # Decode is weight-bandwidth bound: big weight blocks amortize the
        # ~0.35 us per-grid-step overhead.
        tn = _pick_divisor(N, (2048, 1024, 512, 384, 256, 128))
    else:
        tn = _pick_divisor(N, (512, 384, 256, 128))
    # Cap a single bf16 weight block at ~4 MiB (8 MiB double buffered); prefer
    # tk >= 512 so the f32 accumulator RMW hides under MXU time (v5e).
    max_tk = max((4 << 20) // (tn * bpe), _LANE)
    tk = _pick_divisor(
        K, tuple(c for c in (2048, 1536, 1024, 768, 640, 512, 384, 256, 128)
                 if c <= max_tk))
    kt = K // tk
    nt = N // tn

    # M tile: sized to sit above the MXU/HBM knee for prefill
    # (v5e/v6e ~680 flop/byte -> tm~1024; v7x ~310 -> tm~512); decode keeps tm=m.
    target_tm = 512 if vmem_cap <= (80 << 20) else 1024
    tm = m if m <= target_tm else target_tm
    mt = pl.cdiv(m, tm)

    # Dual-TC chips: 'parallel' grid axes need >= 2 points or one core idles.
    if cores >= 2 and mt * nt < 2:
        if tn >= 2 * _LANE and (tn // 2) % _LANE == 0 and N % (tn // 2) == 0:
            tn //= 2
        elif tm > _SUBLANE:
            tm = max(_SUBLANE, -(-(tm // 2) // _SUBLANE) * _SUBLANE)
        nt = N // tn
        mt = pl.cdiv(m, tm)

    def need(x_cols):
        b = 2 * tm * x_cols * bpe                  # x double buffer
        b += 2 * tk * tn * bpe                     # weight double buffer
        b += 2 * tm * tn * bpe                     # output double buffer
        if kt > 1:
            b += tm * tn * 4                       # f32 accumulator scratch
        b += 2 * tn * 4                            # fused bias (worst case)
        return b

    # Prefer x fully K-resident (one x DMA per M tile).  If that overflows the
    # budget (v7x 64 MiB with big tm*K), stream x as (tm, tk) blocks instead of
    # shrinking tm; shrink tm only as a last resort.
    resident_x = need(K) <= budget
    while need(K if resident_x else tk) > budget and tm > _LANE:
        tm = max(_LANE, -(-(tm // 2) // _SUBLANE) * _SUBLANE)
        resident_x = need(K) <= budget

    return tm, tn, tk, resident_x


def _make_kernel(kt, tk, has_bias, resident_x):
    """Kernel body factory.

    Ref order: x_ref, w_ref, [b_ref,] o_ref, [acc_ref (kt > 1 only)]
      x_ref:   (tm, K) bf16 if resident_x else (tm, tk) bf16
      w_ref:   (tk, tn) bf16     ((K, N) layout)
      b_ref:   (1, tn)  f32      (optional)
      o_ref:   (tm, tn) bf16
      acc_ref: (tm, tn) f32
    """
    def epilogue(acc, b_ref, o_ref):
        if has_bias:                               # static (closure) branch
            acc = acc + b_ref[...]                 # bias in f32, pre-downcast
        o_ref[...] = acc.astype(o_ref.dtype)

    if kt == 1:
        # Single K block: one dot, direct store; no accumulator, no phases.
        def single(x_ref, w_ref, b_ref, o_ref):
            epilogue(jnp.dot(x_ref[...], w_ref[...],
                             preferred_element_type=jnp.float32), b_ref, o_ref)
        if has_bias:
            return single
        return lambda x_ref, w_ref, o_ref: single(x_ref, w_ref, None, o_ref)

    def multi(x_ref, w_ref, b_ref, o_ref, acc_ref):
        k = pl.program_id(2)

        @pl.when(k == 0)
        def _():
            acc_ref[...] = jnp.zeros_like(acc_ref)

        if resident_x:
            start = pl.multiple_of(k * tk, 128)
            x_blk = x_ref[:, pl.ds(start, tk)]
        else:
            x_blk = x_ref[...]
        acc_ref[...] += jnp.dot(x_blk, w_ref[...],
                                preferred_element_type=jnp.float32)

        @pl.when(k == pl.num_programs(2) - 1)
        def _():
            epilogue(acc_ref[...], b_ref, o_ref)

    if has_bias:
        return multi
    return lambda x_ref, w_ref, o_ref, acc_ref: multi(x_ref, w_ref, None, o_ref, acc_ref)


def column_parallel_linear(x, weight_t, bias_row=None, *, force_stream_x=False):
    """y = x @ weight_t (+ bias).

    weight_t: (in_features, out_features) — MXU-canonical (K, N) layout,
              i.e. the PyTorch weight transposed once at init.
    bias_row: (1, out_features) float32 or None (pre-cast once at init).
    """
    *lead, in_features = x.shape
    K, N = weight_t.shape
    assert in_features == K

    m = 1
    for d in lead:
        m *= d
    x2d = x.reshape(m, K)

    vmem_cap, cores = _tpu_vmem_and_cores()
    tm, tn, tk, resident_x = _choose_tiles(m, K, N, vmem_cap, cores)
    if force_stream_x:
        resident_x = False

    mt, nt, kt = pl.cdiv(m, tm), N // tn, K // tk
    has_bias = bias_row is not None

    if resident_x:
        # x DMA'd once per M tile, reused for every (j, k); K chunk sliced in-kernel.
        x_spec = pl.BlockSpec((tm, K), lambda i, j, k: (i, 0))
    else:
        # Streamed x: keeps big tm feasible when 2*tm*K*2B would blow VMEM.
        x_spec = pl.BlockSpec((tm, tk), lambda i, j, k: (i, k))

    in_specs = [x_spec,
                pl.BlockSpec((tk, tn), lambda i, j, k: (k, j))]   # (K, N) weight
    args = [x2d, weight_t]
    if has_bias:
        in_specs.append(pl.BlockSpec((1, tn), lambda i, j, k: (0, j)))
        args.append(bias_row)

    scratch = [] if kt == 1 else [pltpu.VMEM((tm, tn), jnp.float32)]

    bpe = x2d.dtype.itemsize
    need = (2 * tm * (K if resident_x else tk) * bpe          # x double buffer
            + 2 * tk * tn * weight_t.dtype.itemsize           # w double buffer
            + 2 * tm * tn * bpe                               # out double buffer
            + (tm * tn * 4 if kt > 1 else 0)                  # f32 accumulator
            + (2 * tn * 4 if has_bias else 0))                # bias
    # Never clamp below the computed need; stay within physical VMEM otherwise.
    vmem_limit = int(min(max(32 << 20, need * 5 // 4 + (4 << 20)),
                         max(vmem_cap, need + (2 << 20))))

    cost = pl.CostEstimate(
        flops=2 * m * K * N,
        transcendentals=0,
        bytes_accessed=(m * K + K * N + m * N) * bpe + (N * 4 if has_bias else 0),
    )

    y2d = pl.pallas_call(
        _make_kernel(kt, tk, has_bias, resident_x),
        out_shape=jax.ShapeDtypeStruct((m, N), x.dtype),      # ragged M: no pad/slice
        grid_spec=pltpu.PrefetchScalarGridSpec(
            num_scalar_prefetch=0,
            grid=(mt, nt, kt),
            in_specs=in_specs,
            out_specs=pl.BlockSpec((tm, tn), lambda i, j, k: (i, j)),
            scratch_shapes=scratch,
        ),
        compiler_params=pltpu.CompilerParams(
            dimension_semantics=("parallel", "parallel", "arbitrary"),
            vmem_limit_bytes=vmem_limit,
        ),
        cost_estimate=cost,
    )(*args)

    return y2d.reshape(*lead, N)


class ColumnParallelLinearPallas:
    """JAX/Pallas equivalent of ColumnParallelLinear (world_size=1, bf16 weights)."""

    world_size = 1
    dtype = jnp.bfloat16

    def __init__(self, in_features, out_features, bias=False, key=None):
        assert out_features % self.world_size == 0
        self.in_features = in_features
        self.part_out_features = out_features // self.world_size
        key = key if key is not None else jax.random.PRNGKey(0)
        wkey, bkey = jax.random.split(key)
        # Reference uses torch.empty; use a small deterministic gaussian instead.
        self.weight = (
            jax.random.normal(wkey, (self.part_out_features, in_features), jnp.float32)
            * 0.02
        ).astype(self.dtype)                       # PyTorch (out, in) layout
        # One-time transpose to the MXU-canonical (in, out) = (K, N) layout.
        self.weight_t = jnp.asarray(self.weight.T)
        self.bias = (
            jax.random.normal(bkey, (self.part_out_features,), jnp.float32)
            if bias else None
        )
        # Bias pre-cast / reshaped once (fused into the kernel's f32 epilogue).
        self.bias_row = (None if self.bias is None
                         else self.bias.astype(jnp.float32).reshape(1, -1))
        # TODO(synk): fp8 weight path (weight.element_size() == 1 with block-wise
        # scale / act_quant / fp8_gemm) is not implemented; dtype here is bf16,
        # matching the F.linear branch of the reference `linear()`.

    def __call__(self, x):
        return column_parallel_linear(x, self.weight_t, self.bias_row)


if __name__ == "__main__":
    key = jax.random.PRNGKey(0)
    k1, k2, k3, k4, k5, k6 = jax.random.split(key, 6)

    # --- test 1: decode-ish shape, no bias, single-K-block fast path ---
    b1, s1, in1, out1 = 2, 8, 256, 512
    x1 = jax.random.normal(k1, (b1, s1, in1), jnp.float32).astype(jnp.bfloat16)
    layer1 = ColumnParallelLinearPallas(in1, out1, bias=False, key=k2)
    y1 = jax.block_until_ready(layer1(x1))
    assert y1.shape == (b1, s1, out1), y1.shape
    assert y1.dtype == jnp.bfloat16, y1.dtype
    ref1 = jnp.einsum("bsk,nk->bsn", x1.astype(jnp.float32),
                      layer1.weight.astype(jnp.float32))
    err1 = float(jnp.max(jnp.abs(y1.astype(jnp.float32) - ref1)))
    assert err1 < 0.05, f"test1 max abs err {err1}"

    # --- test 2: fused bias + K accumulation (kt>1), K-resident activations ---
    b2, s2, in2, out2 = 2, 160, 4096, 256
    x2 = jax.random.normal(k3, (b2, s2, in2), jnp.float32).astype(jnp.bfloat16)
    layer2 = ColumnParallelLinearPallas(in2, out2, bias=True, key=k4)
    y2 = jax.block_until_ready(layer2(x2))
    assert y2.shape == (b2, s2, out2), y2.shape
    assert y2.dtype == jnp.bfloat16, y2.dtype
    ref2 = jnp.einsum("bsk,nk->bsn", x2.astype(jnp.float32),
                      layer2.weight.astype(jnp.float32)) + layer2.bias
    err2 = float(jnp.max(jnp.abs(y2.astype(jnp.float32) - ref2)))
    assert err2 < 0.1, f"test2 max abs err {err2}"

    # --- test 3: ragged M (masked last block, no pad/slice) + streamed-x path ---
    b3, s3, in3, out3 = 4, 275, 2560, 384
    x3 = jax.random.normal(k5, (b3, s3, in3), jnp.float32).astype(jnp.bfloat16)
    layer3 = ColumnParallelLinearPallas(in3, out3, bias=False, key=k6)
    y3 = jax.block_until_ready(
        column_parallel_linear(x3, layer3.weight_t, None, force_stream_x=True))
    assert y3.shape == (b3, s3, out3), y3.shape
    assert y3.dtype == jnp.bfloat16, y3.dtype
    ref3 = jnp.einsum("bsk,nk->bsn", x3.astype(jnp.float32),
                      layer3.weight.astype(jnp.float32))
    err3 = float(jnp.max(jnp.abs(y3.astype(jnp.float32) - ref3)))
    assert err3 < 0.1, f"test3 max abs err {err3}"

    print("KERNEL_OK")
</pallas_src>

<mosaic_0001>
module attributes {stable_mosaic.version = 11 : i64} {
  func.func @_lambda_(%arg0: i32, %arg1: i32, %arg2: i32, %arg3: memref<16x256xbf16, #tpu.memory_space<vmem>>, %arg4: memref<256x256xbf16, #tpu.memory_space<vmem>>, %arg5: memref<16x256xbf16, #tpu.memory_space<vmem>>) attributes {dimension_semantics = [#tpu.dimension_semantics<parallel>, #tpu.dimension_semantics<parallel>, #tpu.dimension_semantics<arbitrary>], iteration_bounds = array<i64: 1, 2, 1>, scalar_prefetch = 0 : i64, scratch_operands = 0 : i64, tpu.core_type = #tpu.core_type<tc>, window_params = [{transform_indices = @transform_0, window_bounds = array<i64: 16, 256>}, {transform_indices = @transform_1, window_bounds = array<i64: 256, 256>}, {transform_indices = @transform_2, window_bounds = array<i64: 16, 256>}]} {
    %c0 = arith.constant 0 : index
    %c0_0 = arith.constant 0 : index
    %0 = vector.load %arg3[%c0, %c0_0] : memref<16x256xbf16, #tpu.memory_space<vmem>>, vector<16x256xbf16>
    %c0_1 = arith.constant 0 : index
    %c0_2 = arith.constant 0 : index
    %1 = vector.load %arg4[%c0_1, %c0_2] : memref<256x256xbf16, #tpu.memory_space<vmem>>, vector<256x256xbf16>
    %cst = arith.constant dense<0.000000e+00> : vector<16x256xf32>
    %2 = tpu.matmul %0, %1, %cst {dimension_numbers = #tpu.dot_dimension_numbers<[1], [0], [0], [1], [0, 0, 1, 1], [], []>} : vector<16x256xbf16>, vector<256x256xbf16>, vector<16x256xf32> -> vector<16x256xf32>
    %3 = arith.truncf %2 : vector<16x256xf32> to vector<16x256xbf16>
    %c0_3 = arith.constant 0 : index
    %c0_4 = arith.constant 0 : index
    %4 = vector.load %arg5[%c0_3, %c0_4] : memref<16x256xbf16, #tpu.memory_space<vmem>>, vector<16x256xbf16>
    tpu.vector_store %arg5[%c0_3, %c0_4], %3 {strides = array<i32>} : memref<16x256xbf16, #tpu.memory_space<vmem>>, vector<16x256xbf16>,
    return
  }
  func.func @transform_0(%arg0: i32, %arg1: i32, %arg2: i32) -> (i32, i32) {
    %c0_i32 = arith.constant 0 : i32
    %c0_i32_0 = arith.constant 0 : i32
    return %arg0, %c0_i32 : i32, i32
  }
  func.func @transform_1(%arg0: i32, %arg1: i32, %arg2: i32) -> (i32, i32) {
    %c0_i32 = arith.constant 0 : i32
    return %arg2, %arg1 : i32, i32
  }
  func.func @transform_2(%arg0: i32, %arg1: i32, %arg2: i32) -> (i32, i32) {
    %c0_i32 = arith.constant 0 : i32
    return %arg0, %arg1 : i32, i32
  }
}

</mosaic_0001>

<bundles_post_ra>
// kernel: tpu_custom_call.1
= control target key start
LH: loop header
LB: loop body
LE: loop exit
PB: predicated region body
PF: predicated region fallthrough
CT: control target
= control target key end

     0   :  { %7 = vsyncpa [#allocation3], 0  ;;  %s1213_s0 = inlined_call_operand.hbm [shape: bf16[16,256], index: 0, kind: input, shape index: {}]   ;;  %s1214_s1 = inlined_call_operand.hbm [shape: bf16[256,512], index: 1, kind: input, shape index: {}]   ;;  %s1215_s2 = inlined_call_operand.hbm [shape: bf16[16,512], index: 2, kind: output, shape index: {}]  }
   0x1   :  { %8 = vsyncpa [#allocation6], 0 }
   0x2   :  { %10 = vsyncpa [#allocation6 + $0x1], 0 }
   0x3   :  { %11 = vsyncpa [#allocation4], 0 }
   0x4   :  { %13 = vsyncpa [#allocation4 + $0x1], 0  ;;  %s953_s9 = smov 0   ;;  %s955_s10 = smov 0  }
   0x5   :  { %s957_s11 = smov 0   ;;  %s959_s12 = smov 0  }
   0x6   :  { %s961_s13 = smov 0   ;;  %s963_s14 = smov 0  }
   0x7 LB: > { %s596_s15 = sadd.s32 4294967295, %s927_s14   ;;  %s597_s16 = sadd.s32 4294967294, %s927_s14   ;;  %s927_s14 = sphi %s963_s14, %s19_s14   ;;  %s923_s13 = sphi %s961_s13, %s1241_s13   ;;  %s919_s12 = sphi %s959_s12, %s1240_s12   ;;  %s915_s11 = sphi %s957_s11, %s1239_s11   ;;  %s911_s10 = sphi %s955_s10, %s1238_s10   ;;  %s907_s9 = sphi %s953_s9, %s1237_s9  }
   0x8   : > { %p80_p0 = scmp.ne.s32.totalorder %s915_s11, %s911_s10  ;;  %p81_p1 = scmp.eq.s32.totalorder %s927_s14, 0 }
   0x9   : > { %p86_p2 = scmp.ne.s32.totalorder %s911_s10, %s907_s9  ;;  %p990_p3 = scmp.eq.s32.totalorder %s596_s15, 0 }
   0xa   : > { %p994_p4 = por %p81_p1, %p80_p0  ;;  %p112_p5 = scmp.eq.s32.totalorder %s596_s15, 1 }
   0xb   : > { %s1222_s17 = scalar_select %p990_p3, 1, 0 }
   0xc   : > { %p1000_p6 = por %p990_p3, %p86_p2  ;;  %p118_p7 = scmp.eq.s32.totalorder %s597_s16, 1 }
   0xd   : > { %p1004_p8 = por %p112_p5, %p80_p0  ;;  %p598_p9 = scmp.ge.s32.totalorder %s927_s14, 1 }
   0xe   : > { %s1224_s19 = scalar_select %p1000_p6, 1, 0 }
   0xf   : > { %s1225_s20 = scalar_select %p1004_p8, 1, 0 }
  0x10   : > { %p1009_p10 = por %p118_p7, %p86_p2  ;;  %p125_p11 = scmp.lt.s32.totalorder %s927_s14, 3 }
  0x11   : > { %s929_s23 = smov [#allocation2]   ;;  %p674_p1 = scmp.lt.s32.totalorder %s927_s14, 2 }
  0x12   : > { %s1226_s21 = scalar_select %p1009_p10, 1, 0 }
  0x13   : > { %p1014_p12 = pnand %p598_p9, %p125_p11  ;;  %s141_s24 = sshll.u32 %s929_s23, 4  ;;  %s1018_s24 = int_to_ptr.vmem [resolvable:$true] %s141_s24 }
  0x14   : > { %p1032_p2 = pnand %p674_p1, %p994_p4  ;;  %s34_s27 = sadd.s32 1, %s923_s13 }
  0x15   : > { %s1227_s22 = scalar_select %p1014_p12, 1, 0 }
  0x16   : > { %p661_p13 = pneg %p1014_p12  ;;  %s783_s30 = scalar_lea.hbm %s1213_s0, 256 }
  0x17   : > { %s1229_s26 = scalar_select %p1032_p2, 1, 0 }
  0x18   : > { %p1026_p5 = pnand %p661_p13, %p990_p3  ;;  %p784_p7 = scmp.ne.s32.totalorder %s1213_s0, %s783_s30 }
  0x19   : > { %p790_p4 = scmp.lt.u32.totalorder %s783_s30, %s1213_s0 }
  0x1a   : > { %p785_p9 = pneg %p1026_p5 }
  0x1c   : > { %p786_p11 = pnand %p785_p9, %p784_p7 }
  0x1e   : > { %p787_p13 = pneg %p786_p11 }
  0x20   : > { %p792_p1 = pnand %p790_p4, %p787_p13 }
  0x22   : > { %795 = shalt.err (!%p792_p1)
}
  0x23   : > { %s796_s7 = scalar_lea.vmem %s1018_s24, 256  ;;  %p804_p6 = scmp.lt.s32.totalorder %s1018_s24, %s1018_s24 }
  0x24   : > { %p797_p0 = scmp.ne.s32.totalorder %s1018_s24, %s796_s7  ;;  %p805_p3 = scmp.lt.s32.totalorder %s796_s7, %s796_s7 }
  0x26   : > { %p799_p10 = pnand %p797_p0, %p785_p9  ;;  %p806_p12 = por %p805_p3, %p804_p6 }
  0x28   : > { %p800_p8 = pneg %p799_p10 }
  0x2a   : > { %p807_p2 = pnand %p806_p12, %p800_p8 }
  0x2c   : > { %810 = shalt.err (!%p807_p2)
}
  0x2d   : > { %s930_s8 = smov 128   ;;  %s931_s15 = smov 8  }
  0x2e   : > { %664 = dma.hbm_to_vmem [thread:$0]  (!%p1026_p5), %s1213_s0, 256, %s1018_s24, [#allocation3], %s930_s8, %s930_s8, %s931_s15  }
  0x2f   : > { %p36_p3 = scmp.ge.s32.totalorder %s34_s27, 2  ;;  %s73_s23 = sadd.s32 1, %s915_s11 }
  0x30   : > { %s155_s28 = sand.u32 1, %s915_s11   ;;  %s649_s3 = sshll.u32 %s923_s13, 7 }
  0x31   : > { %s1243_s27 = smov (%p36_p3, %s34_s27), 0  ;;  %s601_s29 = sshll.u32 %s155_s28, 8 }
  0x32   : > { %s69_s30 = ssub.s32 %s923_s13, %s1243_s27  ;;  %s1071_s5 = scalar_lea.hbm %s1214_s1, %s649_s3 }
  0x33   : > { %p71_p6 = scmp.eq.s32.totalorder %s69_s30, 0  ;;  %s159_s24 = scalar_lea.vmem [#allocation5], %s601_s29 }
  0x34   : > { %s169_s6 = sshll.u32 %s159_s24, 4  ;;  %s1078_s16 = scalar_lea.sflag [#allocation6], %s155_s28  ;;  %s1076_s6 = int_to_ptr.vmem [resolvable:$true] %s169_s6 }
  0x35   : > { %s1074_s7 = scalar_select %p71_p6, %s915_s11, %s73_s23  }
  0x36   : > { %s811_s18 = scalar_lea.hbm %s1071_s5, 4096  ;;  %p1230_p10 = scmp.ne.s32.totalorder %s1229_s26, 0 }
  0x37   : > { %p812_p8 = scmp.ne.s32.totalorder %s1071_s5, %s811_s18  ;;  %s816_s25 = scalar_lea.hbm %s1214_s1, 8192 }
  0x38   : > { %p813_p12 = pneg %p1230_p10  ;;  %p817_p2 = scmp.lt.u32.totalorder %s1071_s5, %s1214_s1 }
  0x39   : > { %p818_p7 = scmp.lt.u32.totalorder %s816_s25, %s811_s18  ;;  %p820_p11 = scmp.lt.u32.totalorder %s811_s18, %s1071_s5 }
  0x3a   : > { %p814_p0 = pnand %p813_p12, %p812_p8 }
  0x3b   : > { %p819_p9 = por %p818_p7, %p817_p2 }
  0x3c   : > { %p815_p5 = pneg %p814_p0 }
  0x3d   : > { %p821_p13 = por %p820_p11, %p819_p9 }
  0x3f   : > { %p822_p4 = pnand %p821_p13, %p815_p5 }
  0x41   : > { %825 = shalt.err (!%p822_p4)
}
  0x42   : > { %s826_s23 = scalar_lea.vmem %s1076_s6, 4096  ;;  %s932_s28 = smov [#allocation5]  }
  0x43   : > { %p827_p1 = scmp.ne.s32.totalorder %s1076_s6, %s826_s23  ;;  %s831_s24 = sshll.u32 %s932_s28, 4  ;;  %s832_s24 = int_to_ptr.vmem [resolvable:$false] %s831_s24 }
  0x44   : > { %s833_s30 = scalar_lea.vmem %s832_s24, 8192  ;;  %p834_p8 = scmp.lt.s32.totalorder %s1076_s6, %s832_s24 }
  0x45   : > { %p829_p3 = pnand %p827_p1, %p813_p12  ;;  %p835_p0 = scmp.lt.s32.totalorder %s833_s30, %s826_s23 }
  0x47   : > { %p830_p6 = pneg %p829_p3  ;;  %p836_p2 = por %p835_p0, %p834_p8 }
  0x49   : > { %p837_p7 = pnand %p836_p2, %p830_p6 }
  0x4b   : > { %840 = shalt.err (!%p837_p7)
}
  0x4c   : > { %s933_s18 = smov 256   ;;  %p1231_p12 = scmp.ne.s32.totalorder %s1227_s22, 0 }
  0x4d   : > { %668 = dma.hbm_to_vmem [thread:$0]  (!%p1230_p10), %s1071_s5, 4096, %s1076_s6, %s1078_s16, %s933_s18, %s930_s8, %s931_s15  }
  0x4e   : > { %181 = sbr.rel (%p1231_p12) target bundleno = 388 (0x184), region = 28  ;;  %p1232_p5 = scmp.ne.s32.totalorder (!%p1231_p12), %s1222_s17, 0 }
  0x55   : > { %894 = dma.done.wait (%p1232_p5), [#allocation3], 256  }
  0x56   : > { %896 = vsyncadd (%p1232_p5), [#allocation3], 4294967040  ;;  %s1115_s3 = sand.u32 1, %s911_s10   ;;  %p1233_p10 = scmp.ne.s32.totalorder %s1224_s19, 0 }
  0x57   : > { %s606_s26 = sshll.u32 %s1115_s3, 8  ;;  %s188_s25 = scalar_lea.sflag [#allocation6], %s1115_s3 }
  0x58   : > { %s1119_s29 = scalar_lea.vmem [#allocation5], %s606_s26 }
  0x59   : > { %898 = dma.done.wait (%p1233_p10), %s188_s25, 4096  }
  0x5a   : > { %900 = vsyncadd (%p1233_p10), %s188_s25, 4294963200  ;;  %v732_v0 = vld [vmem:[%s1119_s29 + $0x4] ss:$8 sps:$4 sm:$0xff]   ;;  %v734_v1 = vld [vmem:[%s1119_s29] ss:$8 sps:$4 sm:$0xff]   ;;  %s607_s17 = sshll.u32 %s1115_s3, 4 }
  0x5b   : > { %421 = vmatprep.subr.bf16.mxu0 %v732_v0  ;;  %v735_v2 = vld [vmem:[%s1119_s29 + $0x14] ss:$8 sps:$4 sm:$0xff]   ;;  %v737_v3 = vld [vmem:[%s1119_s29 + $0x10] ss:$8 sps:$4 sm:$0xff]   ;;  %v738_v4 = vld [vmem:[%s1119_s29 + $0x24] ss:$8 sps:$4 sm:$0xff]  }
  0x5c   : > { %422 = vmatpush1.bf16.msra.mxu0 %v734_v1  ;;  %v740_v5 = vld [vmem:[%s1119_s29 + $0x20] ss:$8 sps:$4 sm:$0xff]   ;;  %v741_v6 = vld [vmem:[%s1119_s29 + $0x34] ss:$8 sps:$4 sm:$0xff]   ;;  %v743_v7 = vld [vmem:[%s1119_s29 + $0x30] ss:$8 sps:$4 sm:$0xff]  }
  0x5d   : > { %423 = vmatprep.subr.bf16.mxu0 %v735_v2  ;;  %v744_v8 = vld [vmem:[%s1119_s29 + $0x44] ss:$8 sps:$4 sm:$0xff]   ;;  %v746_v9 = vld [vmem:[%s1119_s29 + $0x40] ss:$8 sps:$4 sm:$0xff]   ;;  %v747_v10 = vld [vmem:[%s1119_s29 + $0x54] ss:$8 sps:$4 sm:$0xff]  }
  0x5e   : > { %v749_v11 = vld [vmem:[%s1119_s29 + $0x50] ss:$8 sps:$4 sm:$0xff]   ;;  %v750_v12 = vld [vmem:[%s1119_s29 + $0x64] ss:$8 sps:$4 sm:$0xff]   ;;  %v782_v13 = vld [vmem:[#allocation2 + $0x4] ss:$8 sps:$4 sm:$0xff]  }
  0x5f   : > { %v752_v14 = vld [vmem:[%s1119_s29 + $0x60] ss:$8 sps:$4 sm:$0xff]   ;;  %v753_v15 = vld [vmem:[%s1119_s29 + $0x74] ss:$8 sps:$4 sm:$0xff]   ;;  %453 = vmatprep.mubr.bf16.mxu0 %v782_v13  ;;  %v755_v16 = vld [vmem:[%s1119_s29 + $0x70] ss:$8 sps:$4 sm:$0xff]  }
  0x60   : > { %424 = vmatpush1.bf16.msra.mxu0 %v737_v3  ;;  %v756_v17 = vld [vmem:[%s1119_s29 + $0x84] ss:$8 sps:$4 sm:$0xff]   ;;  %v758_v18 = vld [vmem:[%s1119_s29 + $0x80] ss:$8 sps:$4 sm:$0xff]   ;;  %v759_v19 = vld [vmem:[%s1119_s29 + $0x94] ss:$8 sps:$4 sm:$0xff]  }
  0x61   : > { %425 = vmatprep.subr.bf16.mxu0 %v738_v4  ;;  %v761_v20 = vld [vmem:[%s1119_s29 + $0x90] ss:$8 sps:$4 sm:$0xff]   ;;  %v762_v21 = vld [vmem:[%s1119_s29 + $0xa4] ss:$8 sps:$4 sm:$0xff]   ;;  %v764_v22 = vld [vmem:[%s1119_s29 + $0xa0] ss:$8 sps:$4 sm:$0xff]  }
  0x62   : > { %v765_v23 = vld [vmem:[%s1119_s29 + $0xb4] ss:$8 sps:$4 sm:$0xff]   ;;  %v767_v24 = vld [vmem:[%s1119_s29 + $0xb0] ss:$8 sps:$4 sm:$0xff]   ;;  %v768_v25 = vld [vmem:[%s1119_s29 + $0xc4] ss:$8 sps:$4 sm:$0xff]  }
  0x63   : > { %v770_v26 = vld [vmem:[%s1119_s29 + $0xc0] ss:$8 sps:$4 sm:$0xff]   ;;  %v771_v27 = vld [vmem:[%s1119_s29 + $0xd4] ss:$8 sps:$4 sm:$0xff]   ;;  %v773_v28 = vld [vmem:[%s1119_s29 + $0xd0] ss:$8 sps:$4 sm:$0xff]  }
  0x64   : > { %426 = vmatpush1.bf16.msra.mxu0 %v740_v5  ;;  %v774_v29 = vld [vmem:[%s1119_s29 + $0xe4] ss:$8 sps:$4 sm:$0xff]   ;;  %v776_v30 = vld [vmem:[%s1119_s29 + $0xe0] ss:$8 sps:$4 sm:$0xff]   ;;  %v777_v31 = vld [vmem:[%s1119_s29 + $0xf4] ss:$8 sps:$4 sm:$0xff]  }
  0x65   : > { %427 = vmatprep.subr.bf16.mxu0 %v741_v6  ;;  %v779_v32 = vld [vmem:[%s1119_s29 + $0xf0] ss:$8 sps:$4 sm:$0xff]   ;;  %s211_s19 = scalar_lea.vmem [#allocation7], %s607_s17  ;;  %s652_s8 = sshll.u32 %s919_s12, 7 }
  0x66   : > { %v780_v33 = vld [vmem:[#allocation2] ss:$8 sps:$4 sm:$0xff]   ;;  %s495_s22 = sshll.u32 %s211_s19, 4  ;;  %s1164_s6 = scalar_lea.hbm %s1215_s2, %s652_s8  ;;  %s1159_s22 = int_to_ptr.vmem [resolvable:$true] %s495_s22 }
  0x67   : > { %s479_s16 = scalar_lea.sflag [#allocation4], %s1115_s3  ;;  %s841_s4 = scalar_lea.vmem %s1159_s22, 256 }
  0x68   : > { %428 = vmatpush1.bf16.msra.mxu0 %v743_v7  ;;  %p842_p9 = scmp.ne.s32.totalorder %s1159_s22, %s841_s4  ;;  %p1234_p11 = scmp.ne.s32.totalorder %s1225_s20, 0 }
  0x69   : > { %429 = vmatprep.subr.bf16.mxu0 %v744_v8  ;;  %s934_s12 = smov [#allocation7]  }
  0x6a   : > { %p843_p13 = pnand %p842_p9, %p1234_p11  ;;  %s845_s23 = sshll.u32 %s934_s12, 4  ;;  %s846_s23 = int_to_ptr.vmem [resolvable:$false] %s845_s23 }
  0x6b   : > { %s847_s28 = scalar_lea.vmem %s846_s23, 512  ;;  %p848_p1 = scmp.lt.s32.totalorder %s1159_s22, %s846_s23 }
  0x6c   : > { %430 = vmatpush1.bf16.msra.mxu0 %v746_v9  ;;  %p844_p4 = pneg %p843_p13  ;;  %p849_p3 = scmp.lt.s32.totalorder %s847_s28, %s841_s4 }
  0x6d   : > { %431 = vmatprep.subr.bf16.mxu0 %v747_v10 }
  0x6e   : > { %p850_p6 = por %p849_p3, %p848_p1 }
  0x70   : > { %432 = vmatpush1.bf16.msra.mxu0 %v749_v11  ;;  %p851_p8 = pnand %p850_p6, %p844_p4 }
  0x71   : > { %433 = vmatprep.subr.bf16.mxu0 %v750_v12 }
  0x74   : > { %434 = vmatpush1.bf16.msra.mxu0 %v752_v14 }
  0x75   : > { %435 = vmatprep.subr.bf16.mxu0 %v753_v15 }
  0x78   : > { %436 = vmatpush1.bf16.msra.mxu0 %v755_v16 }
  0x79   : > { %437 = vmatprep.subr.bf16.mxu0 %v756_v17 }
  0x7c   : > { %438 = vmatpush1.bf16.msra.mxu0 %v758_v18 }
  0x7d   : > { %439 = vmatprep.subr.bf16.mxu0 %v759_v19 }
  0x80   : > { %440 = vmatpush1.bf16.msra.mxu0 %v761_v20 }
  0x81   : > { %441 = vmatprep.subr.bf16.mxu0 %v762_v21 }
  0x84   : > { %442 = vmatpush1.bf16.msra.mxu0 %v764_v22 }
  0x85   : > { %443 = vmatprep.subr.bf16.mxu0 %v765_v23 }
  0x88   : > { %444 = vmatpush1.bf16.msra.mxu0 %v767_v24 }
  0x89   : > { %445 = vmatprep.subr.bf16.mxu0 %v768_v25 }
  0x8c   : > { %446 = vmatpush1.bf16.msra.mxu0 %v770_v26 }
  0x8d   : > { %447 = vmatprep.subr.bf16.mxu0 %v771_v27 }
  0x90   : > { %448 = vmatpush1.bf16.msra.mxu0 %v773_v28 }
  0x91   : > { %449 = vmatprep.subr.bf16.mxu0 %v774_v29 }
  0x94   : > { %450 = vmatpush1.bf16.msra.mxu0 %v776_v30 }
  0x95   : > { %451 = vmatprep.subr.bf16.mxu0 %v777_v31 }
  0x98   : > { %452 = vmatpush1.bf16.msra.mxu0 %v779_v32 }
  0x9b   : > { %454 = vmatmul.mubr.bf16.vlgmr.msra.gmra.mrb[0].mxu0 %v780_v33 }
 0x16e   : > { %v455_v34 = vpop.f32.mrb[0].mxu0 }
 0x16f   : > { %v457_v35 = vpop.f32.mrb[1].mxu0 }
 0x170   : > { %v650_v36 = vpack.c.bf16 %v457_v35, %v455_v34  ;;  %v459_v37 = vpop.f32.mrb[2].mxu0 }
 0x171   : > { %v461_v38 = vpop.f32.mrb[3].mxu0 }
 0x172   : > { %476 = vst [vmem:[%s211_s19] sm:$0xff] %v650_v36  ;;  %v651_v39 = vpack.c.bf16 %v461_v38, %v459_v37 }
 0x174   : > { %477 = vst [vmem:[%s211_s19 + $0x8] sm:$0xff] %v651_v39 }
 0x175   : > { %854 = shalt.err (!%p851_p8)
}
 0x176   : > { %s855_s24 = scalar_lea.hbm %s1164_s6, 256  ;;  %s859_s26 = scalar_lea.hbm %s1215_s2, 512 }
 0x177   : > { %p856_p0 = scmp.ne.s32.totalorder %s1164_s6, %s855_s24  ;;  %p860_p12 = scmp.lt.u32.totalorder %s1164_s6, %s1215_s2 }
 0x178   : > { %p861_p5 = scmp.lt.u32.totalorder %s859_s26, %s855_s24  ;;  %p863_p9 = scmp.lt.u32.totalorder %s855_s24, %s1164_s6 }
 0x179   : > { %p857_p2 = pnand %p856_p0, %p1234_p11 }
 0x17a   : > { %p862_p10 = por %p861_p5, %p860_p12 }
 0x17b   : > { %p858_p7 = pneg %p857_p2 }
 0x17c   : > { %p864_p13 = por %p863_p9, %p862_p10 }
 0x17e   : > { %p865_p4 = pnand %p864_p13, %p858_p7 }
 0x180   : > { %868 = shalt.err (!%p865_p4)
}
 0x181   : > { %s935_s17 = smov 128   ;;  %s936_s19 = smov 256  }
 0x182   : > { %s937_s8 = smov 8  }
 0x183   : > { %659 = dma.vmem_to_hbm [thread:$0]  (%p1234_p11), %s1159_s22, 256, %s1164_s6, %s479_s16, %s935_s17, %s936_s19, %s937_s8  }
 0x184 PF: > { %s510_s15 = sand.u32 1, %s907_s9   ;;  %p1235_p1 = scmp.ne.s32.totalorder %s1226_s21, 0 }
 0x185   : > { %p1236_p3 = scmp.ge.s32.totalorder %s927_s14, 2  ;;  %s511_s5 = scalar_lea.sflag [#allocation4], %s510_s15 }
 0x187   : > { %p670_p6 = pnand %p1236_p3, %p1235_p1 }
 0x189   : > { %902 = dma.done.wait (!%p670_p6), %s511_s5, 256  }
 0x18a   : > { %904 = vsyncadd (!%p670_p6), %s511_s5, 4294967040  ;;  %s19_s14 = sadd.s32 1, %s927_s14   ;;  %s1237_s9 = smov %s911_s10 }
 0x18b   : > { %p16_p8 = scmp.ge.s32.totalorder %s19_s14, 4   ;;  %s1238_s10 = smov %s915_s11 }
 0x18c   : > { %s1239_s11 = smov %s1074_s7  ;;  %s1240_s12 = smov %s923_s13 }
 0x18d   : > { %s1241_s13 = smov %s1243_s27  ;;  %18 = sbr.rel (!%p16_p8) target bundleno = 7 (0x7), region = 79 }
 0x194   :  { %516 = vsyncpa [#allocation3], 1 }
 0x195   :  { %518 = vsyncpa [#allocation3 + $0x1], 1 }
 0x196   :  { %519 = vsyncpa [#allocation6], 1 }
 0x197   :  { %521 = vsyncpa [#allocation6 + $0x1], 1 }
 0x198   :  { %522 = vsyncpa [#allocation4], 1 }
 0x199   :  { %524 = vsyncpa [#allocation4 + $0x1], 1 }

</bundles_post_ra>
